<compile_context>
chip_gen: v7x
topology: tpu7x:2x2x1
jax: 0.10.0
libtpu: 0.0.40
codegen_flags: <defaults>
</compile_context>

<pallas_src>
import math

import jax
import jax.numpy as jnp
from jax.experimental import pallas as pl
from jax.experimental.pallas import tpu as pltpu


# ----------------------- kernel 1: support = X @ W ---------------------------
def support_kernel(x_ref, w_ref, s_ref):
    s_ref[...] = jnp.dot(
        x_ref[...], w_ref[...], preferred_element_type=jnp.float32
    ).astype(s_ref.dtype)


# ------------------- kernel 2: out = A @ support + bias ----------------------
def adj_matmul_kernel(adj_ref, s_ref, b_ref, o_ref, acc_ref):
    # init accumulator on first reduction step
    @pl.when(pl.program_id(1) == 0)
    def _():
        acc_ref[...] = jnp.zeros_like(acc_ref)

    # MXU accumulate in f32
    acc_ref[...] += jnp.dot(
        adj_ref[...], s_ref[...], preferred_element_type=jnp.float32
    )

    # finalize: bias added exactly once, lane-dense f32 store
    @pl.when(pl.program_id(1) == pl.num_programs(1) - 1)
    def _():
        o_ref[...] = (acc_ref[...] + b_ref[...]).astype(o_ref.dtype)


def graph_convolution(x, adj, weight, bias, *, tm=256, tk=256,
                      compute_dtype=jnp.bfloat16):
    """Pallas GCN forward. x:[N,Fin], adj:[N,N], weight:[Fin,Fout], bias:[Fout]."""
    n, f_in = x.shape
    f_out = weight.shape[1]

    # Pad the node dimension so it divides both tile sizes (zeros are inert:
    # padded adj rows/cols and padded x rows contribute nothing; extra output
    # rows are sliced off at the end).
    tile = (tm * tk) // math.gcd(tm, tk)
    n_pad = pl.cdiv(n, tile) * tile
    if n_pad != n:
        x = jnp.pad(x, ((0, n_pad - n), (0, 0)))
        adj = jnp.pad(adj, ((0, n_pad - n), (0, n_pad - n)))

    x_c = x.astype(compute_dtype)
    w_c = weight.astype(compute_dtype)
    adj_c = adj.astype(compute_dtype)
    bias2d = bias.reshape(1, f_out).astype(jnp.float32)

    # ---- support = X @ W : cheap, computed once, stored bf16 ---------------
    support = pl.pallas_call(
        support_kernel,
        out_shape=jax.ShapeDtypeStruct((n_pad, f_out), compute_dtype),
        grid_spec=pltpu.PrefetchScalarGridSpec(
            num_scalar_prefetch=0,
            grid=(n_pad // tm,),
            in_specs=[
                pl.BlockSpec((tm, f_in), lambda i: (i, 0)),
                pl.BlockSpec((f_in, f_out), lambda i: (0, 0)),  # weight resident
            ],
            out_specs=pl.BlockSpec((tm, f_out), lambda i: (i, 0)),
        ),
        compiler_params=pltpu.CompilerParams(
            dimension_semantics=("parallel",),
            vmem_limit_bytes=32 << 20,
        ),
    )(x_c, w_c)

    # ---- out = A @ support + bias : dominant, tiled over rows x reduction --
    grid = (n_pad // tm, n_pad // tk)
    dsize = jnp.dtype(compute_dtype).itemsize
    cost = pl.CostEstimate(
        flops=2 * n_pad * n_pad * f_out,
        transcendentals=0,
        bytes_accessed=(n_pad * n_pad * dsize               # adj stream
                        + grid[0] * n_pad * f_out * dsize   # support re-read per row tile
                        + n_pad * f_out * 4),               # f32 output
    )

    out = pl.pallas_call(
        adj_matmul_kernel,
        out_shape=jax.ShapeDtypeStruct((n_pad, f_out), jnp.float32),
        grid_spec=pltpu.PrefetchScalarGridSpec(
            num_scalar_prefetch=0,
            grid=grid,
            in_specs=[
                pl.BlockSpec((tm, tk), lambda i, k: (i, k)),       # adj tile
                pl.BlockSpec((tk, f_out), lambda i, k: (k, 0)),    # support tile
                pl.BlockSpec((1, f_out), lambda i, k: (0, 0)),     # bias resident
            ],
            out_specs=pl.BlockSpec((tm, f_out), lambda i, k: (i, 0)),
            scratch_shapes=[pltpu.VMEM((tm, f_out), jnp.float32)],
        ),
        compiler_params=pltpu.CompilerParams(
            dimension_semantics=("parallel", "arbitrary"),
            vmem_limit_bytes=32 << 20,
        ),
        cost_estimate=cost,
    )(adj_c, support, bias2d)

    return out[:n]


if __name__ == "__main__":
    # Small but tiling-exercising sizes: grid = (2, 2) with TM = TK = 256.
    N = 512          # number of graph nodes
    F_IN = 64        # in_features
    F_OUT = 128      # out_features

    key = jax.random.PRNGKey(0)
    k_x, k_adj, k_w, k_b = jax.random.split(key, 4)

    # Deterministic parameter init mirroring reset_parameters():
    # uniform(-stdv, stdv) with stdv = 1 / sqrt(out_features)
    stdv = 1.0 / math.sqrt(F_OUT)
    weight = jax.random.uniform(
        k_w, (F_IN, F_OUT), dtype=jnp.float32, minval=-stdv, maxval=stdv)
    bias = jax.random.uniform(
        k_b, (F_OUT,), dtype=jnp.float32, minval=-stdv, maxval=stdv)

    # Inputs: node features and a dense row-normalized adjacency matrix.
    x = jax.random.normal(k_x, (N, F_IN), dtype=jnp.float32)
    adj_raw = (jax.random.uniform(k_adj, (N, N)) < 0.05).astype(jnp.float32)
    adj_raw = adj_raw + jnp.eye(N, dtype=jnp.float32)          # self loops
    adj = adj_raw / jnp.sum(adj_raw, axis=1, keepdims=True)    # row-normalize

    out = graph_convolution(x, adj, weight, bias)
    out = jax.block_until_ready(out)
    assert out.shape == (N, F_OUT)

    # Matched-precision reference (same bf16 casts, f32 accumulation).
    support_ref = jnp.dot(
        x.astype(jnp.bfloat16), weight.astype(jnp.bfloat16),
        preferred_element_type=jnp.float32).astype(jnp.bfloat16)
    ref_bf16 = jnp.dot(
        adj.astype(jnp.bfloat16), support_ref,
        preferred_element_type=jnp.float32) + bias
    assert jnp.allclose(out, ref_bf16, atol=1e-3, rtol=1e-3), "mismatch vs bf16 ref"

    # Loose check against the pure-f32 math of the original PyTorch module.
    ref_f32 = adj @ (x @ weight) + bias
    assert jnp.allclose(out, ref_f32, atol=3e-2, rtol=3e-2), "mismatch vs f32 ref"

    print("KERNEL_OK")
</pallas_src>

<mosaic_0001>
module attributes {stable_mosaic.version = 11 : i64} {
  func.func @support_kernel(%arg0: i32, %arg1: memref<256x64xbf16, #tpu.memory_space<vmem>>, %arg2: memref<64x128xbf16, #tpu.memory_space<vmem>>, %arg3: memref<256x128xbf16, #tpu.memory_space<vmem>>) attributes {dimension_semantics = [#tpu.dimension_semantics<parallel>], iteration_bounds = array<i64: 2>, scalar_prefetch = 0 : i64, scratch_operands = 0 : i64, tpu.core_type = #tpu.core_type<tc>, window_params = [{transform_indices = @transform_0, window_bounds = array<i64: 256, 64>}, {pipeline_mode = #tpu.pipeline_mode<synchronous>, transform_indices = @transform_1, window_bounds = array<i64: 64, 128>}, {transform_indices = @transform_2, window_bounds = array<i64: 256, 128>}]} {
    %c0 = arith.constant 0 : index
    %c0_0 = arith.constant 0 : index
    %0 = vector.load %arg1[%c0, %c0_0] : memref<256x64xbf16, #tpu.memory_space<vmem>>, vector<256x64xbf16>
    %c0_1 = arith.constant 0 : index
    %c0_2 = arith.constant 0 : index
    %1 = vector.load %arg2[%c0_1, %c0_2] : memref<64x128xbf16, #tpu.memory_space<vmem>>, vector<64x128xbf16>
    %cst = arith.constant dense<0.000000e+00> : vector<256x128xf32>
    %2 = tpu.matmul %0, %1, %cst {dimension_numbers = #tpu.dot_dimension_numbers<[1], [0], [0], [1], [0, 0, 1, 1], [], []>} : vector<256x64xbf16>, vector<64x128xbf16>, vector<256x128xf32> -> vector<256x128xf32>
    %3 = arith.truncf %2 : vector<256x128xf32> to vector<256x128xbf16>
    %c0_3 = arith.constant 0 : index
    %c0_4 = arith.constant 0 : index
    %4 = vector.load %arg3[%c0_3, %c0_4] : memref<256x128xbf16, #tpu.memory_space<vmem>>, vector<256x128xbf16>
    tpu.vector_store %arg3[%c0_3, %c0_4], %3 {strides = array<i32>} : memref<256x128xbf16, #tpu.memory_space<vmem>>, vector<256x128xbf16>,
    return
  }
  func.func @transform_0(%arg0: i32) -> (i32, i32) {
    %c0_i32 = arith.constant 0 : i32
    %c0_i32_0 = arith.constant 0 : i32
    return %arg0, %c0_i32 : i32, i32
  }
  func.func @transform_1(%arg0: i32) -> (i32, i32) {
    %c0_i32 = arith.constant 0 : i32
    %c0_i32_0 = arith.constant 0 : i32
    %c0_i32_1 = arith.constant 0 : i32
    return %c0_i32, %c0_i32_0 : i32, i32
  }
  func.func @transform_2(%arg0: i32) -> (i32, i32) {
    %c0_i32 = arith.constant 0 : i32
    %c0_i32_0 = arith.constant 0 : i32
    return %arg0, %c0_i32 : i32, i32
  }
}

</mosaic_0001>

<bundles_post_ra>
// kernel: tpu_custom_call.1
= control target key start
LH: loop header
LB: loop body
LE: loop exit
PB: predicated region body
PF: predicated region fallthrough
CT: control target
= control target key end

     0   :  { %7 = vsyncpa [#allocation3], 0  ;;  %s1326_s0 = inlined_call_operand.vmem [shape: bf16[512,64], index: 0, kind: input, shape index: {}]   ;;  %s1327_s1 = inlined_call_operand.vmem [shape: bf16[64,128], index: 1, kind: input, shape index: {}]   ;;  %s1328_s2 = inlined_call_operand.hbm [shape: bf16[512,128], index: 2, kind: output, shape index: {}]  }
   0x1   :  { %9 = vsyncpa [#allocation3 + $0x1], 0  ;;  %s1155_s9 = smov 0   ;;  %s1157_s10 = smov 0  }
   0x2   :  { %s1159_s11 = smov 0   ;;  %s1161_s12 = smov 0  }
   0x3 LB: > { %s1176_s13 = sadd.s32 4294967295, %s1135_s12   ;;  %s736_s14 = sadd.s32 4294967294, %s1135_s12   ;;  %s1135_s12 = sphi %s1161_s12, %s1334_s12   ;;  %s1131_s11 = sphi %s1159_s11, %s1333_s11   ;;  %s1127_s10 = sphi %s1157_s10, %s1332_s10   ;;  %s1123_s9 = sphi %s1155_s9, %s1331_s9  }
   0x4   : > { %s1180_s15 = sadd.s32 1, %s1135_s12   ;;  %s69_s16 = sadd.s32 1, %s1131_s11 }
   0x5   : > { %s66_s17 = ssub.s32 %s1135_s12, %s1180_s15  ;;  %p79_p0 = scmp.ne.s32.totalorder %s1131_s11, %s1127_s10 }
   0x6   : > { %p67_p1 = scmp.eq.s32.totalorder %s66_s17, 0  ;;  %p80_p2 = scmp.eq.s32.totalorder %s1176_s13, 1 }
   0x7   : > { %p85_p3 = scmp.ne.s32.totalorder %s1127_s10, %s1123_s9  ;;  %p86_p4 = scmp.eq.s32.totalorder %s736_s14, 1 }
   0x8   : > { %s1191_s18 = scalar_select %p67_p1, %s1131_s11, %s69_s16  }
   0x9   : > { %p1193_p5 = por %p80_p2, %p79_p0  ;;  %p1197_p6 = por %p86_p4, %p85_p3 }
   0xa   : > { %p739_p7 = scmp.ge.s32.totalorder %s1135_s12, 1  ;;  %p116_p8 = scmp.lt.s32.totalorder %s1135_s12, 3 }
   0xc   : > { %p117_p9 = pnand %p739_p7, %p116_p8 }
   0xd   : > { %v1053_v0 = vld [vmem:[%s1327_s1] sm:$0xff] (!%p117_p9)   ;;  %s741_s23 = sshll.u32 (!%p117_p9), %s1176_s13, 5  ;;  %v1054_v1 = vld [vmem:[%s1327_s1 + $0x8] sm:$0xff] (!%p117_p9)   ;;  %v1055_v2 = vld [vmem:[%s1327_s1 + $0x10] sm:$0xff] (!%p117_p9)   ;;  %vm290_vm0 = vcmask (!%p117_p9), 523264   ;;  %s135_s6 = sand.u32 (!%p117_p9), 1, %s1127_s10  }
   0xe   : > { %120 = sbr.rel (%p117_p9) target bundleno = 286 (0x11e), region = 28  ;;  %p139_p10 = scmp.lt.s32.totalorder (!%p117_p9), %s741_s23, 63  ;;  %964 = vmatprep.subr.bf16.mxu0 (!%p117_p9), %v1053_v0  ;;  %1004 = vmatprep.subr.bf16.mxu1 (!%p117_p9), %v1053_v0  ;;  %v1056_v3 = vld [vmem:[%s1327_s1 + $0x18] sm:$0xff] (!%p117_p9)  }
   0xf   : > { %965 = vmatpush3.bf16.msra.mxu0 (!%p117_p9), %v1053_v0  ;;  %1008 = vmatpush3.bf16.msra.mxu1 (!%p117_p9), %v1053_v0  ;;  %s740_s7 = sshll.u32 (!%p117_p9), %s135_s6, 7  ;;  %s848_s14 = sshll.u32 (!%p117_p9), %s1176_s13, 11 }
  0x10   : > { %966 = vmatprep.subr.bf16.mxu0 (!%p117_p9), %v1054_v1  ;;  %1005 = vmatprep.subr.bf16.mxu1 (!%p117_p9), %v1054_v1  ;;  %s1256_s8 = scalar_lea.vmem (!%p117_p9), [#allocation2], %s740_s7  ;;  %s1275_s22 = scalar_lea.hbm (!%p117_p9), %s1328_s2, %s848_s14 }
  0x11   : > { %s674_s16 = sshll.u32 (!%p117_p9), %s1256_s8, 4  ;;  %s1285_s13 = scalar_lea.sflag (!%p117_p9), [#allocation3], %s135_s6  ;;  %s1277_s16 = int_to_ptr.vmem [resolvable:$true] %s674_s16 }
  0x12   : > { %s1137_s24 = smov (!%p117_p9), [#allocation2]  }
  0x13   : > { %967 = vmatpush3.bf16.msra.mxu0 (!%p117_p9), %v1054_v1  ;;  %1009 = vmatpush3.bf16.msra.mxu1 (!%p117_p9), %v1054_v1  ;;  %s1077_s25 = sshll.u32 (!%p117_p9), %s1137_s24, 4  ;;  %s1078_s25 = int_to_ptr.vmem [resolvable:$false] %s1077_s25 }
  0x14   : > { %968 = vmatprep.subr.bf16.mxu0 (!%p117_p9), %v1055_v2  ;;  %1006 = vmatprep.subr.bf16.mxu1 (!%p117_p9), %v1055_v2  ;;  %s1079_s26 = scalar_lea.vmem (!%p117_p9), %s1078_s25, 4096  ;;  %p1080_p0 = scmp.lt.s32.totalorder (!%p117_p9), %s1277_s16, %s1078_s25 }
  0x15   : > { %s1336_s23 = smov (!%p139_p10, %s741_s23), 63 }
  0x16   : > { %s742_s28 = sshll.u32 %s1336_s23, 2  ;;  %s1073_s23 = scalar_lea.vmem %s1277_s16, 2048 }
  0x17   : > { %s1219_s5 = scalar_lea.vmem %s1326_s0, %s742_s28  ;;  %969 = vmatpush3.bf16.msra.mxu0 %v1055_v2  ;;  %1010 = vmatpush3.bf16.msra.mxu1 %v1055_v2  ;;  %p1074_p11 = scmp.ne.s32.totalorder %s1277_s16, %s1073_s23 }
  0x18   : > { %v1057_v4 = vld [vmem:[%s1219_s5] sm:$0xff]   ;;  %970 = vmatprep.subr.bf16.mxu0 %v1056_v3  ;;  %1007 = vmatprep.subr.bf16.mxu1 %v1056_v3  ;;  %v1059_v6 = vld [vmem:[%s1219_s5 + $0x8] sm:$0xff]   ;;  %v1061_v8 = vld [vmem:[%s1219_s5 + $0x10] sm:$0xff]   ;;  %p1081_p1 = scmp.lt.s32.totalorder %s1079_s26, %s1073_s23 }
  0x19   : > { %v1058_v5 = vld [vmem:[%s1219_s5 + $0x40] sm:$0xff]   ;;  %972 = vmatprep.mubr.msk.bf16.mxu0 %vm290_vm0, %v1057_v4  ;;  %v1060_v7 = vld [vmem:[%s1219_s5 + $0x48] sm:$0xff]   ;;  %v1062_v9 = vld [vmem:[%s1219_s5 + $0x50] sm:$0xff]   ;;  %p1075_p12 = pnand %p1074_p11, %p1193_p5 }
  0x1a   : > { %988 = vmatprep.mubr.msk.bf16.mxu1 %vm290_vm0, %v1058_v5  ;;  %v1063_v10 = vld [vmem:[%s1219_s5 + $0x18] sm:$0xff]   ;;  %v1065_v12 = vld [vmem:[%s1219_s5 + $0x20] sm:$0xff]   ;;  %v1067_v14 = vld [vmem:[%s1219_s5 + $0x28] sm:$0xff]   ;;  %p1082_p2 = por %p1081_p1, %p1080_p0 }
  0x1b   : > { %971 = vmatpush3.bf16.msra.mxu0 %v1056_v3  ;;  %1011 = vmatpush3.bf16.msra.mxu1 %v1056_v3  ;;  %v1064_v11 = vld [vmem:[%s1219_s5 + $0x58] sm:$0xff]   ;;  %v1066_v13 = vld [vmem:[%s1219_s5 + $0x60] sm:$0xff]   ;;  %v1068_v15 = vld [vmem:[%s1219_s5 + $0x68] sm:$0xff]   ;;  %p1076_p13 = pneg %p1075_p12 }
  0x1c   : > { %v1069_v16 = vld [vmem:[%s1219_s5 + $0x30] sm:$0xff]   ;;  %v1071_v18 = vld [vmem:[%s1219_s5 + $0x38] sm:$0xff]  }
  0x1d   : > { %v1070_v17 = vld [vmem:[%s1219_s5 + $0x70] sm:$0xff]   ;;  %v1072_v19 = vld [vmem:[%s1219_s5 + $0x78] sm:$0xff]   ;;  %p1083_p3 = pnand %p1082_p2, %p1076_p13 }
  0x1e   : > { %973 = vmatmul.mubr.msk.bf16.vlgmr.msra.gmra.mrb[0].mxu0 %vm290_vm0, %v1059_v6  ;;  %989 = vmatmul.mubr.msk.bf16.vlgmr.msra.gmra.mrb[0].mxu1 %vm290_vm0, %v1060_v7 }
  0x1f   : > { %976 = vmatprep.mubr.msk.bf16.mxu0 %vm290_vm0, %v1061_v8  ;;  %992 = vmatprep.mubr.msk.bf16.mxu1 %vm290_vm0, %v1062_v9 }
  0x26   : > { %977 = vmatmul.mubr.msk.bf16.gmra.mrb[4].mxu0 %vm290_vm0, %v1063_v10  ;;  %993 = vmatmul.mubr.msk.bf16.gmra.mrb[4].mxu1 %vm290_vm0, %v1064_v11 }
  0x27   : > { %980 = vmatprep.mubr.msk.bf16.mxu0 %vm290_vm0, %v1065_v12  ;;  %996 = vmatprep.mubr.msk.bf16.mxu1 %vm290_vm0, %v1066_v13 }
  0x2e   : > { %981 = vmatmul.mubr.msk.bf16.gmra.mrb[8].mxu0 %vm290_vm0, %v1067_v14  ;;  %997 = vmatmul.mubr.msk.bf16.gmra.mrb[8].mxu1 %vm290_vm0, %v1068_v15 }
  0x2f   : > { %984 = vmatprep.mubr.msk.bf16.mxu0 %vm290_vm0, %v1069_v16  ;;  %1000 = vmatprep.mubr.msk.bf16.mxu1 %vm290_vm0, %v1070_v17 }
  0x36   : > { %985 = vmatmul.mubr.msk.bf16.gmra.mrb[12].mxu0 %vm290_vm0, %v1071_v18  ;;  %1001 = vmatmul.mubr.msk.bf16.gmra.mrb[12].mxu1 %vm290_vm0, %v1072_v19 }
  0xf1   : > { %v974_v20 = vpop.f32.mrb[0].mxu0  ;;  %v990_v21 = vpop.f32.mrb[0].mxu1 }
  0xf2   : > { %v373_v22 = vpop.f32.mrb[1].mxu0  ;;  %v437_v23 = vpop.f32.mrb[1].mxu1 }
  0xf3   : > { %v975_v24 = vpop.f32.mrb[2].mxu0  ;;  %v991_v25 = vpop.f32.mrb[2].mxu1 }
  0xf4   : > { %v857_v26 = vpack.c.bf16 %v975_v24, %v974_v20  ;;  %v897_v27 = vpack.c.bf16 %v991_v25, %v990_v21  ;;  %v376_v28 = vpop.f32.mrb[3].mxu0  ;;  %v440_v29 = vpop.f32.mrb[3].mxu1 }
  0xf5   : > { %v852_v30 = vpack.c.bf16 %v376_v28, %v373_v22  ;;  %v892_v31 = vpack.c.bf16 %v440_v29, %v437_v23 }
  0xf6   : > { %929 = vst [vmem:[%s1256_s8 + $0x8] sm:$0xff] %v857_v26   ;;  %937 = vst [vmem:[%s1256_s8 + $0x48] sm:$0xff] %v897_v27  }
  0xf7   : > { %853 = vst [vmem:[%s1256_s8] sm:$0xff] %v852_v30   ;;  %936 = vst [vmem:[%s1256_s8 + $0x40] sm:$0xff] %v892_v31  }
  0xf9   : > { %v978_v32 = vpop.f32.mrb[4].mxu0  ;;  %v994_v33 = vpop.f32.mrb[4].mxu1 }
  0xfa   : > { %v389_v34 = vpop.f32.mrb[5].mxu0  ;;  %v453_v35 = vpop.f32.mrb[5].mxu1 }
  0xfb   : > { %v979_v36 = vpop.f32.mrb[6].mxu0  ;;  %v995_v37 = vpop.f32.mrb[6].mxu1 }
  0xfc   : > { %v867_v38 = vpack.c.bf16 %v979_v36, %v978_v32  ;;  %v907_v39 = vpack.c.bf16 %v995_v37, %v994_v33  ;;  %v392_v40 = vpop.f32.mrb[7].mxu0  ;;  %v456_v41 = vpop.f32.mrb[7].mxu1 }
  0xfd   : > { %v862_v42 = vpack.c.bf16 %v392_v40, %v389_v34  ;;  %v902_v43 = vpack.c.bf16 %v456_v41, %v453_v35 }
  0xfe   : > { %931 = vst [vmem:[%s1256_s8 + $0x18] sm:$0xff] %v867_v38   ;;  %939 = vst [vmem:[%s1256_s8 + $0x58] sm:$0xff] %v907_v39  }
  0xff   : > { %930 = vst [vmem:[%s1256_s8 + $0x10] sm:$0xff] %v862_v42   ;;  %938 = vst [vmem:[%s1256_s8 + $0x50] sm:$0xff] %v902_v43  }
 0x101   : > { %v982_v44 = vpop.f32.mrb[8].mxu0  ;;  %v998_v45 = vpop.f32.mrb[8].mxu1 }
 0x102   : > { %v405_v46 = vpop.f32.mrb[9].mxu0  ;;  %v469_v47 = vpop.f32.mrb[9].mxu1 }
 0x103   : > { %v983_v48 = vpop.f32.mrb[10].mxu0  ;;  %v999_v49 = vpop.f32.mrb[10].mxu1 }
 0x104   : > { %v877_v50 = vpack.c.bf16 %v983_v48, %v982_v44  ;;  %v917_v51 = vpack.c.bf16 %v999_v49, %v998_v45  ;;  %v408_v52 = vpop.f32.mrb[11].mxu0  ;;  %v472_v53 = vpop.f32.mrb[11].mxu1 }
 0x105   : > { %v872_v54 = vpack.c.bf16 %v408_v52, %v405_v46  ;;  %v912_v55 = vpack.c.bf16 %v472_v53, %v469_v47 }
 0x106   : > { %933 = vst [vmem:[%s1256_s8 + $0x28] sm:$0xff] %v877_v50   ;;  %941 = vst [vmem:[%s1256_s8 + $0x68] sm:$0xff] %v917_v51  }
 0x107   : > { %932 = vst [vmem:[%s1256_s8 + $0x20] sm:$0xff] %v872_v54   ;;  %940 = vst [vmem:[%s1256_s8 + $0x60] sm:$0xff] %v912_v55  }
 0x109   : > { %v986_v56 = vpop.f32.mrb[12].mxu0  ;;  %v1002_v57 = vpop.f32.mrb[12].mxu1 }
 0x10a   : > { %v421_v58 = vpop.f32.mrb[13].mxu0  ;;  %v485_v59 = vpop.f32.mrb[13].mxu1 }
 0x10b   : > { %v987_v60 = vpop.f32.mrb[14].mxu0  ;;  %v1003_v61 = vpop.f32.mrb[14].mxu1 }
 0x10c   : > { %v887_v62 = vpack.c.bf16 %v987_v60, %v986_v56  ;;  %v927_v63 = vpack.c.bf16 %v1003_v61, %v1002_v57  ;;  %v424_v0 = vpop.f32.mrb[15].mxu0  ;;  %v488_v1 = vpop.f32.mrb[15].mxu1 }
 0x10d   : > { %v882_v2 = vpack.c.bf16 %v424_v0, %v421_v58  ;;  %v922_v3 = vpack.c.bf16 %v488_v1, %v485_v59 }
 0x10e   : > { %935 = vst [vmem:[%s1256_s8 + $0x38] sm:$0xff] %v887_v62   ;;  %943 = vst [vmem:[%s1256_s8 + $0x78] sm:$0xff] %v927_v63  }
 0x10f   : > { %934 = vst [vmem:[%s1256_s8 + $0x30] sm:$0xff] %v882_v2   ;;  %942 = vst [vmem:[%s1256_s8 + $0x70] sm:$0xff] %v922_v3  }
 0x110   : > { %1086 = shalt.err (!%p1083_p3)
}
 0x111   : > { %s1087_s27 = scalar_lea.hbm %s1275_s22, 2048  ;;  %s1091_s30 = scalar_lea.hbm %s1328_s2, 4096 }
 0x112   : > { %p1088_p4 = scmp.ne.s32.totalorder %s1275_s22, %s1087_s27  ;;  %p1092_p9 = scmp.lt.u32.totalorder %s1275_s22, %s1328_s2 }
 0x113   : > { %p1093_p10 = scmp.lt.u32.totalorder %s1091_s30, %s1087_s27  ;;  %p1095_p12 = scmp.lt.u32.totalorder %s1087_s27, %s1275_s22 }
 0x114   : > { %p1089_p7 = pnand %p1088_p4, %p1193_p5 }
 0x115   : > { %p1094_p11 = por %p1093_p10, %p1092_p9 }
 0x116   : > { %p1090_p8 = pneg %p1089_p7 }
 0x117   : > { %p1096_p13 = por %p1095_p12, %p1094_p11 }
 0x119   : > { %p1097_p0 = pnand %p1096_p13, %p1090_p8 }
 0x11b   : > { %1100 = shalt.err (!%p1097_p0)
}
 0x11c   : > { %s1138_s5 = smov 64   ;;  %s1139_s6 = smov 4  }
 0x11d   : > { %1012 = dma.vmem_to_hbm [thread:$0]  (%p1193_p5), %s1277_s16, 2048, %s1275_s22, %s1285_s13, %s1138_s5, %s1138_s5, %s1139_s6  }
 0x11e PF: > { %p1018_p1 = scmp.ge.s32.totalorder %s1135_s12, 2  ;;  %s689_s7 = sand.u32 1, %s1123_s9  }
 0x11f   : > { %s690_s8 = scalar_lea.sflag [#allocation3], %s689_s7 }
 0x120   : > { %p1015_p2 = pnand %p1018_p1, %p1197_p6 }
 0x122   : > { %1118 = dma.done.wait (!%p1015_p2), %s690_s8, 2048  }
 0x123   : > { %1120 = vsyncadd (!%p1015_p2), %s690_s8, 4294965248  ;;  %p12_p3 = scmp.ge.s32.totalorder %s1180_s15, 4   ;;  %s1331_s9 = smov %s1127_s10 }
 0x124   : > { %s1332_s10 = smov %s1131_s11  ;;  %s1333_s11 = smov %s1191_s18 }
 0x125   : > { %s1334_s12 = smov %s1180_s15  ;;  %14 = sbr.rel (!%p12_p3) target bundleno = 3 (0x3), region = 63 }
 0x12c   :  { %695 = vsyncpa [#allocation3], 1 }
 0x12d   :  { %697 = vsyncpa [#allocation3 + $0x1], 1 }

</bundles_post_ra>
